<compile_context>
chip_gen: v5e
topology: v5e:2x2
jax: 0.10.0
libtpu: 0.0.40
codegen_flags: <defaults>
</compile_context>

<pallas_src>
import functools

import jax
import jax.numpy as jnp
from jax.experimental import pallas as pl
from jax.experimental.pallas import tpu as pltpu

EXPANSION = 4
BN_EPS = 1e-5
VMEM_LIMIT_BYTES = 48 * 1024 * 1024  # below v7x 64 MiB physical, above default scoped limits


# --------------------------------------------------------------------------------------
# Small helpers
# --------------------------------------------------------------------------------------
def _rup(x, m):
    return ((x + m - 1) // m) * m


def _choose_tm(m_pad):
    """Largest M tile (<=512) that divides m_pad while keeping >=2 grid steps."""
    for tm in (512, 256, 128, 64, 32, 16, 8):
        if m_pad % tm == 0 and m_pad // tm >= 2:
            return tm
    return m_pad


def _pad_rows(a, m_pad):
    m = a.shape[0]
    return a if m == m_pad else jnp.pad(a, ((0, m_pad - m), (0, 0)))


def _pad_w2d(w, k_p, c_p):
    k, c = w.shape
    return jnp.pad(w, ((0, k_p - k), (0, c_p - c))).astype(jnp.bfloat16)


def _fold_bn_padded(bn, c_p, eps=BN_EPS):
    gamma, beta, mean, var = bn
    scale = gamma / jnp.sqrt(var + eps)
    bias = beta - mean * scale
    pad = c_p - scale.shape[0]
    return (jnp.pad(scale, (0, pad)).reshape(1, c_p).astype(jnp.float32),
            jnp.pad(bias, (0, pad)).reshape(1, c_p).astype(jnp.float32))


def _mosaic_params():
    return pltpu.CompilerParams(dimension_semantics=("parallel",),
                                vmem_limit_bytes=VMEM_LIMIT_BYTES)


# --------------------------------------------------------------------------------------
# Pallas kernels
# --------------------------------------------------------------------------------------
def _matmul_bn_kernel(a_ref, w_ref, scale_ref, bias_ref, o_ref, *, apply_relu):
    acc = jnp.dot(a_ref[...], w_ref[...], preferred_element_type=jnp.float32)
    y = acc * scale_ref[...] + bias_ref[...]
    if apply_relu:
        y = jnp.maximum(y, 0.0)
    o_ref[...] = y.astype(o_ref.dtype)


def _conv3x3_bn_relu_kernel(y_ref, w_ref, scale_ref, bias_ref, o_ref):
    # y_ref: (1, H+2, W+2, C) bf16 (spatially zero-padded y1), resident in VMEM.
    # w_ref: (3, 3, C, Cout) bf16.  Accumulate 9 shifted-tap matmuls in f32.
    _, hp, wp, c = y_ref.shape
    ho = hp - 2
    wo = wp - 2
    cout = w_ref.shape[3]
    acc = jnp.zeros((ho * wo, cout), jnp.float32)
    for dh in range(3):
        for dw in range(3):
            a = y_ref[0, dh:dh + ho, dw:dw + wo, :]
            acc = acc + jnp.dot(a.reshape(ho * wo, c), w_ref[dh, dw],
                                preferred_element_type=jnp.float32)
    y = jnp.maximum(acc * scale_ref[...] + bias_ref[...], 0.0)
    o_ref[...] = y.reshape(1, ho, wo, cout).astype(o_ref.dtype)


def _matmul_bn_addskip_relu_kernel(a_ref, w_ref, scale_ref, bias_ref, sc_ref, sw_ref, o_ref):
    # identity shortcut: out = relu((A@W)*s + b + skip_weight * shortcut)
    acc = jnp.dot(a_ref[...], w_ref[...], preferred_element_type=jnp.float32)
    res = acc * scale_ref[...] + bias_ref[...]
    sc = sc_ref[...].astype(jnp.float32)
    o_ref[...] = jnp.maximum(res + sw_ref[0, 0] * sc, 0.0).astype(o_ref.dtype)


def _matmul_bn_projskip_relu_kernel(a_ref, w_ref, scale_ref, bias_ref,
                                    xs_ref, ws_ref, ss_ref, bs_ref, sw_ref, o_ref):
    # projection shortcut fused: out = relu((A@W3)*s3 + b3 + sw * ((Xs@Ws)*ss + bs))
    acc = jnp.dot(a_ref[...], w_ref[...], preferred_element_type=jnp.float32)
    res = acc * scale_ref[...] + bias_ref[...]
    sc = jnp.dot(xs_ref[...], ws_ref[...], preferred_element_type=jnp.float32)
    sc = sc * ss_ref[...] + bs_ref[...]
    o_ref[...] = jnp.maximum(res + sw_ref[0, 0] * sc, 0.0).astype(o_ref.dtype)


# --------------------------------------------------------------------------------------
# Pallas call wrappers
# --------------------------------------------------------------------------------------
def matmul_bn(a, w, scale, bias, *, apply_relu, out_dtype=jnp.float32):
    """relu?((a @ w) * scale + bias). a:(M,K) bf16, w:(K,C) bf16, scale/bias:(1,C) f32."""
    m, k = a.shape
    c = w.shape[1]
    m_pad = _rup(m, 128)
    a_p = _pad_rows(a, m_pad)
    tm = _choose_tm(m_pad)
    kern = functools.partial(_matmul_bn_kernel, apply_relu=apply_relu)
    out = pl.pallas_call(
        kern,
        out_shape=jax.ShapeDtypeStruct((m_pad, c), out_dtype),
        grid=(m_pad // tm,),
        in_specs=[
            pl.BlockSpec((tm, k), lambda i: (i, 0)),
            pl.BlockSpec((k, c), lambda i: (0, 0)),
            pl.BlockSpec((1, c), lambda i: (0, 0)),
            pl.BlockSpec((1, c), lambda i: (0, 0)),
        ],
        out_specs=pl.BlockSpec((tm, c), lambda i: (i, 0)),
        compiler_params=_mosaic_params(),
    )(a_p, w, scale, bias)
    return out if m_pad == m else out[:m]


def conv3x3_bn_relu(y1_spad, w2, scale, bias, out_dtype=jnp.bfloat16):
    """3x3 conv (stride 1, input already spatially zero-padded by 1) + BN + ReLU."""
    n, hp, wp, c = y1_spad.shape
    ho, wo = hp - 2, wp - 2
    cout = w2.shape[3]
    return pl.pallas_call(
        _conv3x3_bn_relu_kernel,
        out_shape=jax.ShapeDtypeStruct((n, ho, wo, cout), out_dtype),
        grid=(n,),
        in_specs=[
            pl.BlockSpec((1, hp, wp, c), lambda i: (i, 0, 0, 0)),
            pl.BlockSpec((3, 3, c, cout), lambda i: (0, 0, 0, 0)),
            pl.BlockSpec((1, cout), lambda i: (0, 0)),
            pl.BlockSpec((1, cout), lambda i: (0, 0)),
        ],
        out_specs=pl.BlockSpec((1, ho, wo, cout), lambda i: (i, 0, 0, 0)),
        compiler_params=_mosaic_params(),
    )(y1_spad, w2, scale, bias)


def matmul_bn_addskip_relu(a, w, scale, bias, sc, skip_weight):
    m, k = a.shape
    c = w.shape[1]
    m_pad = _rup(m, 128)
    a_p, sc_p = _pad_rows(a, m_pad), _pad_rows(sc, m_pad)
    tm = _choose_tm(m_pad)
    sw = jnp.asarray(skip_weight, jnp.float32).reshape(1, 1)
    out = pl.pallas_call(
        _matmul_bn_addskip_relu_kernel,
        out_shape=jax.ShapeDtypeStruct((m_pad, c), jnp.float32),
        grid=(m_pad // tm,),
        in_specs=[
            pl.BlockSpec((tm, k), lambda i: (i, 0)),
            pl.BlockSpec((k, c), lambda i: (0, 0)),
            pl.BlockSpec((1, c), lambda i: (0, 0)),
            pl.BlockSpec((1, c), lambda i: (0, 0)),
            pl.BlockSpec((tm, c), lambda i: (i, 0)),
            pl.BlockSpec(memory_space=pltpu.MemorySpace.SMEM),
        ],
        out_specs=pl.BlockSpec((tm, c), lambda i: (i, 0)),
        compiler_params=_mosaic_params(),
    )(a_p, w, scale, bias, sc_p, sw)
    return out if m_pad == m else out[:m]


def matmul_bn_projskip_relu(a, w3, s3, b3, xs, ws, ss, bs, skip_weight):
    m, k3 = a.shape
    ks = xs.shape[1]
    c = w3.shape[1]
    m_pad = _rup(m, 128)
    a_p, xs_p = _pad_rows(a, m_pad), _pad_rows(xs, m_pad)
    tm = _choose_tm(m_pad)
    sw = jnp.asarray(skip_weight, jnp.float32).reshape(1, 1)
    out = pl.pallas_call(
        _matmul_bn_projskip_relu_kernel,
        out_shape=jax.ShapeDtypeStruct((m_pad, c), jnp.float32),
        grid=(m_pad // tm,),
        in_specs=[
            pl.BlockSpec((tm, k3), lambda i: (i, 0)),
            pl.BlockSpec((k3, c), lambda i: (0, 0)),
            pl.BlockSpec((1, c), lambda i: (0, 0)),
            pl.BlockSpec((1, c), lambda i: (0, 0)),
            pl.BlockSpec((tm, ks), lambda i: (i, 0)),
            pl.BlockSpec((ks, c), lambda i: (0, 0)),
            pl.BlockSpec((1, c), lambda i: (0, 0)),
            pl.BlockSpec((1, c), lambda i: (0, 0)),
            pl.BlockSpec(memory_space=pltpu.MemorySpace.SMEM),
        ],
        out_specs=pl.BlockSpec((tm, c), lambda i: (i, 0)),
        compiler_params=_mosaic_params(),
    )(a_p, w3, s3, b3, xs_p, ws, ss, bs, sw)
    return out if m_pad == m else out[:m]


# --------------------------------------------------------------------------------------
# Parameter init + forward (glue in plain JAX)
# --------------------------------------------------------------------------------------
def init_bottleneck_params(key, in_channels, out_channels, stride):
    cexp = out_channels * EXPANSION
    ks = jax.random.split(key, 8)

    def bn_params(k, c):
        k1, k2, k3, k4 = jax.random.split(k, 4)
        gamma = 1.0 + 0.1 * jax.random.normal(k1, (c,), jnp.float32)
        beta = 0.1 * jax.random.normal(k2, (c,), jnp.float32)
        mean = 0.1 * jax.random.normal(k3, (c,), jnp.float32)
        var = 1.0 + 0.1 * jnp.abs(jax.random.normal(k4, (c,), jnp.float32))
        return (gamma, beta, mean, var)

    params = {
        "w1": 0.1 * jax.random.normal(ks[0], (out_channels, in_channels, 1, 1), jnp.float32),
        "bn1": bn_params(ks[1], out_channels),
        "w2": 0.1 * jax.random.normal(ks[2], (out_channels, out_channels, 3, 3), jnp.float32),
        "bn2": bn_params(ks[3], out_channels),
        "w3": 0.1 * jax.random.normal(ks[4], (cexp, out_channels, 1, 1), jnp.float32),
        "bn3": bn_params(ks[5], cexp),
        "skip_weight": jnp.array(0.5, jnp.float32),
    }
    if stride != 1 or in_channels != cexp:
        params["ws"] = 0.1 * jax.random.normal(ks[6], (cexp, in_channels, 1, 1), jnp.float32)
        params["bns"] = bn_params(ks[7], cexp)
    return params


def bottleneck_forward(x_nchw, params, stride):
    x = jnp.transpose(x_nchw, (0, 2, 3, 1)).astype(jnp.float32)  # NHWC
    n, h, w, cin = x.shape
    cmid = params["w1"].shape[0]
    cout = params["w3"].shape[0]
    cin_p, cmid_p, cout_p = _rup(cin, 128), _rup(cmid, 128), _rup(cout, 128)

    # channel-pad once, cast to bf16 for the MXU (epilogues are f32 in-kernel)
    x_p = jnp.pad(x, ((0, 0), (0, 0), (0, 0), (0, cin_p - cin))).astype(jnp.bfloat16)

    # ---- conv1 (1x1) + BN + ReLU ---------------------------------------------------
    w1 = _pad_w2d(params["w1"][:, :, 0, 0].T, cin_p, cmid_p)
    s1, b1 = _fold_bn_padded(params["bn1"], cmid_p)
    y1 = matmul_bn(x_p.reshape(n * h * w, cin_p), w1, s1, b1,
                   apply_relu=True, out_dtype=jnp.bfloat16)
    y1 = y1.reshape(n, h, w, cmid_p)

    # ---- conv2 (3x3, pad=1) + BN + ReLU  (9-tap VMEM-resident kernel, no im2col) ----
    y1_spad = jnp.pad(y1, ((0, 0), (1, 1), (1, 1), (0, 0)))
    w2 = jnp.transpose(params["w2"], (2, 3, 1, 0))               # (3,3,Cin,Cout)
    w2 = jnp.pad(w2, ((0, 0), (0, 0), (0, cmid_p - cmid), (0, cmid_p - cmid))
                 ).astype(jnp.bfloat16)
    s2, b2 = _fold_bn_padded(params["bn2"], cmid_p)
    y2 = conv3x3_bn_relu(y1_spad, w2, s2, b2)                    # (n, h, w, cmid_p) bf16
    if stride != 1:
        # TODO(synk): stride>1 path computes the stride-1 3x3 conv and subsamples; an
        # in-kernel strided tap load would avoid the extra stride^2 compute on this stage.
        y2 = y2[:, ::stride, ::stride, :]
    ho, wo = y2.shape[1], y2.shape[2]
    m = n * ho * wo
    a3 = y2.reshape(m, cmid_p)

    # ---- conv3 (1x1) + BN + skip_weight*shortcut + ReLU (shortcut fully fused) ------
    w3 = _pad_w2d(params["w3"][:, :, 0, 0].T, cmid_p, cout_p)
    s3, b3 = _fold_bn_padded(params["bn3"], cout_p)
    sw = params["skip_weight"]

    if "ws" in params:
        xs = x_p[:, ::stride, ::stride, :].reshape(m, cin_p)
        ws = _pad_w2d(params["ws"][:, :, 0, 0].T, cin_p, cout_p)
        ss, bs = _fold_bn_padded(params["bns"], cout_p)
        out = matmul_bn_projskip_relu(a3, w3, s3, b3, xs, ws, ss, bs, sw)
    else:
        assert stride == 1 and cin == cout, \
            "identity shortcut requires stride==1 and in_channels == out_channels*expansion"
        sc = x_p.reshape(m, cout_p)          # cin_p == cout_p here
        out = matmul_bn_addskip_relu(a3, w3, s3, b3, sc, sw)

    out = out[:, :cout].reshape(n, ho, wo, cout)
    return jnp.transpose(out, (0, 3, 1, 2))                      # back to NCHW


# --------------------------------------------------------------------------------------
# Pure-JAX reference (NCHW, mirrors the PyTorch module in eval mode)
# --------------------------------------------------------------------------------------
def _ref_conv(x, w, stride, padding):
    return jax.lax.conv_general_dilated(
        x, w, window_strides=(stride, stride), padding=padding,
        dimension_numbers=("NCHW", "OIHW", "NCHW"),
        precision=jax.lax.Precision.HIGHEST)


def _ref_bn(x, bn, eps=BN_EPS):
    g, b, m, v = bn
    inv = g / jnp.sqrt(v + eps)
    return x * inv[None, :, None, None] + (b - m * inv)[None, :, None, None]


def bottleneck_reference(x, params, stride):
    r = _ref_conv(x, params["w1"], 1, ((0, 0), (0, 0)))
    r = jnp.maximum(_ref_bn(r, params["bn1"]), 0.0)
    r = _ref_conv(r, params["w2"], stride, ((1, 1), (1, 1)))
    r = jnp.maximum(_ref_bn(r, params["bn2"]), 0.0)
    r = _ref_conv(r, params["w3"], 1, ((0, 0), (0, 0)))
    r = _ref_bn(r, params["bn3"])
    if "ws" in params:
        s = _ref_conv(x, params["ws"], stride, ((0, 0), (0, 0)))
        s = _ref_bn(s, params["bns"])
    else:
        s = x
    return jnp.maximum(r + params["skip_weight"] * s, 0.0)


# --------------------------------------------------------------------------------------
if __name__ == "__main__":
    key = jax.random.PRNGKey(0)
    k1, k2, k3, k4 = jax.random.split(key, 4)

    # Case 1: projection shortcut (stride=2, in_channels != out_channels*4)
    batch, in_c, out_c, spatial, stride = 2, 16, 8, 8, 2
    x = jax.random.normal(k1, (batch, in_c, spatial, spatial), jnp.float32)
    params = init_bottleneck_params(k2, in_c, out_c, stride)
    out = jax.block_until_ready(bottleneck_forward(x, params, stride))
    ref = jax.block_until_ready(bottleneck_reference(x, params, stride))
    assert out.shape == (batch, out_c * EXPANSION, spatial // stride, spatial // stride)
    err = float(jnp.max(jnp.abs(out - ref)))
    assert err < 5e-2, f"projection path max abs err {err}"

    # Case 2: identity shortcut (stride=1, in_channels == out_channels*4)
    batch2, in_c2, out_c2, spatial2, stride2 = 2, 32, 8, 8, 1
    x2 = jax.random.normal(k3, (batch2, in_c2, spatial2, spatial2), jnp.float32)
    params2 = init_bottleneck_params(k4, in_c2, out_c2, stride2)
    out2 = jax.block_until_ready(bottleneck_forward(x2, params2, stride2))
    ref2 = jax.block_until_ready(bottleneck_reference(x2, params2, stride2))
    assert out2.shape == (batch2, out_c2 * EXPANSION, spatial2, spatial2)
    err2 = float(jnp.max(jnp.abs(out2 - ref2)))
    assert err2 < 5e-2, f"identity path max abs err {err2}"

    print("KERNEL_OK")
</pallas_src>

<mosaic_0001>
module attributes {stable_mosaic.version = 11 : i64} {
  func.func @_matmul_bn_kernel(%arg0: i32, %arg1: memref<64x128xbf16, #tpu.memory_space<vmem>>, %arg2: memref<128x128xbf16, #tpu.memory_space<vmem>>, %arg3: memref<1x128xf32, #tpu.memory_space<vmem>>, %arg4: memref<1x128xf32, #tpu.memory_space<vmem>>, %arg5: memref<64x128xbf16, #tpu.memory_space<vmem>>) attributes {dimension_semantics = [#tpu.dimension_semantics<parallel>], iteration_bounds = array<i64: 2>, scalar_prefetch = 0 : i64, scratch_operands = 0 : i64, tpu.core_type = #tpu.core_type<tc>, window_params = [{transform_indices = @transform_0, window_bounds = array<i64: 64, 128>}, {pipeline_mode = #tpu.pipeline_mode<synchronous>, transform_indices = @transform_1, window_bounds = array<i64: 128, 128>}, {pipeline_mode = #tpu.pipeline_mode<synchronous>, transform_indices = @transform_2, window_bounds = array<i64: 1, 128>}, {pipeline_mode = #tpu.pipeline_mode<synchronous>, transform_indices = @transform_3, window_bounds = array<i64: 1, 128>}, {transform_indices = @transform_4, window_bounds = array<i64: 64, 128>}]} {
    %c0 = arith.constant 0 : index
    %c0_0 = arith.constant 0 : index
    %0 = vector.load %arg1[%c0, %c0_0] : memref<64x128xbf16, #tpu.memory_space<vmem>>, vector<64x128xbf16>
    %c0_1 = arith.constant 0 : index
    %c0_2 = arith.constant 0 : index
    %1 = vector.load %arg2[%c0_1, %c0_2] : memref<128x128xbf16, #tpu.memory_space<vmem>>, vector<128x128xbf16>
    %cst = arith.constant dense<0.000000e+00> : vector<64x128xf32>
    %2 = tpu.matmul %0, %1, %cst {dimension_numbers = #tpu.dot_dimension_numbers<[1], [0], [0], [1], [0, 0, 1, 1], [], []>} : vector<64x128xbf16>, vector<128x128xbf16>, vector<64x128xf32> -> vector<64x128xf32>
    %c0_3 = arith.constant 0 : index
    %c0_4 = arith.constant 0 : index
    %3 = vector.load %arg3[%c0_3, %c0_4] : memref<1x128xf32, #tpu.memory_space<vmem>>, vector<1x128xf32>
    %4 = vector.broadcast %3 : vector<1x128xf32> to vector<64x128xf32>
    %5 = arith.mulf %2, %4 : vector<64x128xf32>
    %c0_5 = arith.constant 0 : index
    %c0_6 = arith.constant 0 : index
    %6 = vector.load %arg4[%c0_5, %c0_6] : memref<1x128xf32, #tpu.memory_space<vmem>>, vector<1x128xf32>
    %7 = vector.broadcast %6 : vector<1x128xf32> to vector<64x128xf32>
    %8 = arith.addf %5, %7 : vector<64x128xf32>
    %cst_7 = arith.constant 0.000000e+00 : f32
    %9 = vector.broadcast %cst_7 : f32 to vector<64x128xf32>
    %10 = arith.maximumf %8, %9 : vector<64x128xf32>
    %11 = arith.truncf %10 : vector<64x128xf32> to vector<64x128xbf16>
    %c0_8 = arith.constant 0 : index
    %c0_9 = arith.constant 0 : index
    %12 = vector.load %arg5[%c0_8, %c0_9] : memref<64x128xbf16, #tpu.memory_space<vmem>>, vector<64x128xbf16>
    tpu.vector_store %arg5[%c0_8, %c0_9], %11 {strides = array<i32>} : memref<64x128xbf16, #tpu.memory_space<vmem>>, vector<64x128xbf16>,
    return
  }
  func.func @transform_0(%arg0: i32) -> (i32, i32) {
    %c0_i32 = arith.constant 0 : i32
    %c0_i32_0 = arith.constant 0 : i32
    return %arg0, %c0_i32 : i32, i32
  }
  func.func @transform_1(%arg0: i32) -> (i32, i32) {
    %c0_i32 = arith.constant 0 : i32
    %c0_i32_0 = arith.constant 0 : i32
    %c0_i32_1 = arith.constant 0 : i32
    return %c0_i32, %c0_i32_0 : i32, i32
  }
  func.func @transform_2(%arg0: i32) -> (i32, i32) {
    %c0_i32 = arith.constant 0 : i32
    %c0_i32_0 = arith.constant 0 : i32
    %c0_i32_1 = arith.constant 0 : i32
    return %c0_i32, %c0_i32_0 : i32, i32
  }
  func.func @transform_3(%arg0: i32) -> (i32, i32) {
    %c0_i32 = arith.constant 0 : i32
    %c0_i32_0 = arith.constant 0 : i32
    %c0_i32_1 = arith.constant 0 : i32
    return %c0_i32, %c0_i32_0 : i32, i32
  }
  func.func @transform_4(%arg0: i32) -> (i32, i32) {
    %c0_i32 = arith.constant 0 : i32
    %c0_i32_0 = arith.constant 0 : i32
    return %arg0, %c0_i32 : i32, i32
  }
}

</mosaic_0001>

<bundles_post_ra>
// kernel: tpu_custom_call.1
= control target key start
LH: loop header
LB: loop body
LE: loop exit
PB: predicated region body
PF: predicated region fallthrough
CT: control target
= control target key end

     0   :  { %9 = vsyncpa [#allocation3], 0  ;;  %s1019_s0 = inlined_call_operand.hbm [shape: bf16[128,128], index: 0, kind: input, shape index: {}]   ;;  %s1020_s1 = inlined_call_operand.hbm [shape: bf16[128,128], index: 1, kind: input, shape index: {}]   ;;  %s1021_s2 = inlined_call_operand.vmem [shape: f32[1,128], index: 2, kind: input, shape index: {}]   ;;  %s1022_s3 = inlined_call_operand.vmem [shape: f32[1,128], index: 3, kind: input, shape index: {}]   ;;  %s1023_s4 = inlined_call_operand.hbm [shape: bf16[128,128], index: 4, kind: output, shape index: {}]  }
   0x1   :  { %11 = vsyncpa [#allocation3 + $0x1], 0 }
   0x2   :  { %12 = vsyncpa [#allocation6], 0 }
   0x3   :  { %13 = vsyncpa [#allocation4], 0 }
   0x4   :  { %15 = vsyncpa [#allocation4 + $0x1], 0  ;;  %s859_s15 = smov 0   ;;  %s861_s16 = smov 0  }
   0x5   :  { %s863_s17 = smov 0   ;;  %s865_s18 = smov 0  }
   0x6 LB: > { %s880_s19 = sadd.s32 4294967295, %s827_s18   ;;  %s509_s20 = sadd.s32 4294967294, %s827_s18   ;;  %s827_s18 = sphi %s865_s18, %s1033_s18   ;;  %s823_s17 = sphi %s863_s17, %s1032_s17   ;;  %s819_s16 = sphi %s861_s16, %s1031_s16   ;;  %s815_s15 = sphi %s859_s15, %s1030_s15  }
   0x7   : > { %p41_p0 = scmp.ne.s32.totalorder %s819_s16, %s815_s15  ;;  %p42_p1 = scmp.eq.s32.totalorder %s880_s19, 0 }
   0x8   : > { %p128_p2 = scmp.eq.s32.totalorder %s880_s19, 1  ;;  %p134_p3 = scmp.eq.s32.totalorder %s509_s20, 1 }
   0x9   : > { %p889_p4 = por %p42_p1, %p41_p0  ;;  %p510_p5 = scmp.ge.s32.totalorder %s827_s18, 1 }
   0xa   : > { %p894_p6 = por %p134_p3, %p41_p0  ;;  %p141_p7 = scmp.lt.s32.totalorder %s827_s18, 3 }
   0xb   : > { %s152_s25 = sshll.u32 %s1020_s1, 4  ;;  %s829_s27 = smov [#allocation5]   ;;  %s153_s25 = int_to_ptr.hbm [resolvable:$true] %s152_s25 }
   0xc   : > { %p902_p8 = pnand %p510_p5, %p141_p7  ;;  %s154_s28 = sshll.u32 %s829_s27, 4  ;;  %s155_s28 = int_to_ptr.vmem [resolvable:$true] %s154_s28 }
   0xd   : > { %s912_s29 = sadd.s32 1, %s827_s18   ;;  %s830_s30 = smov 64  }
   0xe   : > { %p642_p9 = pneg %p902_p8  ;;  %s831_s5 = smov 4  }
   0xf   : > { %s25_s6 = ssub.s32 %s827_s18, %s912_s29  ;;  %s28_s7 = sadd.s32 1, %s823_s17 }
  0x10   : > { %p643_p10 = pnand %p642_p9, %p42_p1  ;;  %p26_p12 = scmp.eq.s32.totalorder %s25_s6, 0 }
  0x11   : > { %p35_p13 = scmp.ne.s32.totalorder %s823_s17, %s819_s16  ;;  %p36_p0 = scmp.eq.s32.totalorder %s827_s18, 0 }
  0x12   : > { %645 = dma.hbm_to_vmem [thread:$0]  (!%p643_p10), %s153_s25, 1024, %s155_s28, [#allocation6], %s830_s30, %s830_s30, %s831_s5  }
  0x13   : > { %s924_s8 = scalar_select %p26_p12, %s823_s17, %s28_s7  }
  0x14   : > { %p928_p3 = por %p128_p2, %p35_p13  ;;  %p655_p5 = scmp.lt.s32.totalorder %s827_s18, 2 }
  0x15   : > { %s174_s10 = sand.u32 1, %s823_s17   ;;  %s573_s11 = sshll.u32 %s827_s18, 5 }
  0x16   : > { %p37_p7 = por %p36_p0, %p35_p13  ;;  %s513_s12 = sshll.u32 %s174_s10, 5 }
  0x17   : > { %s183_s20 = scalar_lea.hbm %s1019_s0, %s573_s11  ;;  %s178_s24 = scalar_lea.vmem [#allocation2], %s513_s12 }
  0x18   : > { %s184_s23 = sshll.u32 %s183_s20, 4  ;;  %s186_s25 = sshll.u32 %s178_s24, 4  ;;  %s185_s23 = int_to_ptr.hbm [resolvable:$true] %s184_s23  ;;  %s187_s25 = int_to_ptr.vmem [resolvable:$true] %s186_s25 }
  0x19   : > { %p938_p9 = pnand %p655_p5, %p37_p7  ;;  %s175_s28 = scalar_lea.sflag [#allocation3], %s174_s10 }
  0x1a   : > { %s727_s6 = sshra.s32 %s185_s23, 4  ;;  %s734_s12 = scalar_lea.hbm %s1019_s0, 64  ;;  %s728_s6 = int_to_ptr.hbm [resolvable:$true] %s727_s6 }
  0x1b   : > { %s729_s7 = scalar_lea.hbm %s728_s6, 32  ;;  %p731_p10 = pneg %p938_p9 }
  0x1c   : > { %p730_p2 = scmp.ne.s32.totalorder %s728_s6, %s729_s7  ;;  %p735_p0 = scmp.lt.s32.totalorder %s728_s6, %s1019_s0 }
  0x1d   : > { %p736_p5 = scmp.lt.s32.totalorder %s734_s12, %s729_s7 }
  0x1e   : > { %p732_p12 = pnand %p731_p10, %p730_p2 }
  0x1f   : > { %p737_p7 = por %p736_p5, %p735_p0 }
  0x20   : > { %p733_p13 = pneg %p732_p12 }
  0x22   : > { %p738_p11 = pnand %p737_p7, %p733_p13 }
  0x24   : > { %741 = shalt.err (!%p738_p11)
}
  0x25   : > { %649 = dma.hbm_to_vmem [thread:$0]  (!%p938_p9), %s185_s23, 512, %s187_s25, %s175_s28, %s830_s30, %s830_s30, %s831_s5  }
  0x26   : > { %198 = sbr.rel (%p902_p8) target bundleno = 232 (0xe8), region = 36  ;;  %s958_s10 = sand.u32 (!%p902_p8), 1, %s819_s16  }
  0x27   : > { %s517_s24 = sshll.u32 (!%p902_p8), %s958_s10, 5  ;;  %s201_s6 = scalar_lea.sflag (!%p902_p8), [#allocation3], %s958_s10 }
  0x28   : > { %s964_s7 = scalar_lea.vmem (!%p902_p8), [#allocation2], %s517_s24 }
  0x2b   : > { %802 = dma.done.wait (%p889_p4), %s201_s6, 512  }
  0x2c   : > { %804 = vsyncadd (%p889_p4), %s201_s6, 4294966784 }
  0x2d   : > { %806 = dma.done.wait (%p42_p1), [#allocation6], 1024  }
  0x2e   : > { %808 = vsyncadd (%p42_p1), [#allocation6], 4294966272  ;;  %v585_v0 = vld [vmem:[#allocation5 + $0x38] sm:$0xff]  ;;  %v584_v1 = vld [vmem:[#allocation5 + $0x30] sm:$0xff]  ;;  %s586_s23 = sshll.u32 %s880_s19, 5  ;;  %s234_s11 = scalar_lea.vmem [#allocation7], %s517_s24 }
  0x2f   : > { %333 = vmatpush.bf16.msra.mxu0 %v585_v0  ;;  %610 = vmatpush.bf16.msra.mxu1 %v585_v0  ;;  %v583_v2 = vld [vmem:[#allocation5 + $0x28] sm:$0xff]  ;;  %v582_v3 = vld [vmem:[#allocation5 + $0x20] sm:$0xff]  ;;  %v581_v4 = vld [vmem:[#allocation5 + $0x18] sm:$0xff]  ;;  %s422_s28 = scalar_lea.hbm %s1023_s4, %s586_s23  ;;  %s423_s13 = sshll.u32 %s234_s11, 4  ;;  %s424_s13 = int_to_ptr.vmem [resolvable:$true] %s423_s13 }
  0x30   : > { %611 = vmatpush.bf16.msra.mxu2 %v585_v0  ;;  %612 = vmatpush.bf16.msra.mxu3 %v585_v0  ;;  %v580_v5 = vld [vmem:[#allocation5 + $0x10] sm:$0xff]  ;;  %v579_v6 = vld [vmem:[#allocation5 + $0x8] sm:$0xff]  ;;  %v578_v7 = vld [vmem:[#allocation5] sm:$0xff]  ;;  %s425_s19 = sshll.u32 %s422_s28, 4  ;;  %s411_s12 = scalar_lea.sflag [#allocation4], %s958_s10  ;;  %s426_s19 = int_to_ptr.hbm [resolvable:$true] %s425_s19 }
  0x31   : > { %v574_v8 = vld [vmem:[%s964_s7] sm:$0xff]  ;;  %v575_v9 = vld [vmem:[%s964_s7 + $0x8] sm:$0xff]  ;;  %v576_v10 = vld [vmem:[%s964_s7 + $0x10] sm:$0xff]  ;;  %s771_s14 = sshra.s32 %s426_s19, 4  ;;  %s772_s14 = int_to_ptr.hbm [resolvable:$true] %s771_s14 }
  0x32   : > { %v577_v11 = vld [vmem:[%s964_s7 + $0x18] sm:$0xff]  ;;  %v695_v14 = vld [vmem:[%s1021_s2] ss:$0 sm:$0xff]  ;;  %s773_s20 = scalar_lea.hbm %s772_s14, 32  ;;  %s777_s7 = scalar_lea.hbm %s1023_s4, 64 }
  0x33   : > { %334 = vmatpush.bf16.msra.mxu0 %v584_v1  ;;  %613 = vmatpush.bf16.msra.mxu1 %v584_v1  ;;  %v696_v16 = vld [vmem:[%s1022_s3] ss:$0 sm:$0xff]  ;;  %p774_p1 = scmp.ne.s32.totalorder %s772_s14, %s773_s20  ;;  %p778_p11 = scmp.lt.s32.totalorder %s772_s14, %s1023_s4 }
  0x34   : > { %614 = vmatpush.bf16.msra.mxu2 %v584_v1  ;;  %615 = vmatpush.bf16.msra.mxu3 %v584_v1  ;;  %p779_p9 = scmp.lt.s32.totalorder %s777_s7, %s773_s20 }
  0x35   : > { %p775_p4 = pnand %p774_p1, %p928_p3 }
  0x36   : > { %p780_p2 = por %p779_p9, %p778_p11 }
  0x37   : > { %335 = vmatpush.bf16.msra.mxu0 %v583_v2  ;;  %616 = vmatpush.bf16.msra.mxu1 %v583_v2  ;;  %p776_p8 = pneg %p775_p4 }
  0x38   : > { %617 = vmatpush.bf16.msra.mxu2 %v583_v2  ;;  %618 = vmatpush.bf16.msra.mxu3 %v583_v2 }
  0x39   : > { %p781_p10 = pnand %p780_p2, %p776_p8 }
  0x3b   : > { %336 = vmatpush.bf16.msra.mxu0 %v582_v3  ;;  %619 = vmatpush.bf16.msra.mxu1 %v582_v3 }
  0x3c   : > { %620 = vmatpush.bf16.msra.mxu2 %v582_v3  ;;  %621 = vmatpush.bf16.msra.mxu3 %v582_v3 }
  0x3f   : > { %337 = vmatpush.bf16.msra.mxu0 %v581_v4  ;;  %622 = vmatpush.bf16.msra.mxu1 %v581_v4 }
  0x40   : > { %623 = vmatpush.bf16.msra.mxu2 %v581_v4  ;;  %624 = vmatpush.bf16.msra.mxu3 %v581_v4 }
  0x43   : > { %338 = vmatpush.bf16.msra.mxu0 %v580_v5  ;;  %625 = vmatpush.bf16.msra.mxu1 %v580_v5 }
  0x44   : > { %626 = vmatpush.bf16.msra.mxu2 %v580_v5  ;;  %627 = vmatpush.bf16.msra.mxu3 %v580_v5 }
  0x47   : > { %339 = vmatpush.bf16.msra.mxu0 %v579_v6  ;;  %628 = vmatpush.bf16.msra.mxu1 %v579_v6 }
  0x48   : > { %629 = vmatpush.bf16.msra.mxu2 %v579_v6  ;;  %630 = vmatpush.bf16.msra.mxu3 %v579_v6 }
  0x4b   : > { %340 = vmatpush.bf16.msra.mxu0 %v578_v7  ;;  %631 = vmatpush.bf16.msra.mxu1 %v578_v7 }
  0x4c   : > { %632 = vmatpush.bf16.msra.mxu2 %v578_v7  ;;  %633 = vmatpush.bf16.msra.mxu3 %v578_v7 }
  0x4e   : > { %341 = vmatmul.bf16.vlgmr.msra.gmra.mxu0 %v574_v8  ;;  %346 = vmatmul.bf16.vlgmr.msra.gmra.mxu1 %v575_v9 }
  0x4f   : > { %351 = vmatmul.bf16.vlgmr.msra.gmra.mxu2 %v576_v10  ;;  %356 = vmatmul.bf16.vlgmr.msra.gmra.mxu3 %v577_v11 }
  0xcb   : > { %v342_v12 = vpop.f32.mrf.mxu0  ;;  %v347_v13 = vpop.f32.mrf.mxu1 }
  0xcc   : > { %v366_v15 = vmul.f32 %v695_v14, %v342_v12  ;;  %v368_v17 = vmul.f32 %v695_v14, %v347_v13 }
  0xce   : > { %v378_v22 = vadd.f32 %v696_v16, %v366_v15  ;;  %v380_v23 = vadd.f32 %v696_v16, %v368_v17 }
  0xd0   : > { %v386_v30 = vmax.f32 %v378_v22, 0.0  ;;  %v388_v31 = vmax.f32 %v380_v23, 0.0 }
  0xd2   : > { %v352_v18 = vpop.f32.mrf.mxu2  ;;  %v357_v19 = vpop.f32.mrf.mxu3 }
  0xd3   : > { %v344_v20 = vpop.f32.mrf.mxu0  ;;  %v349_v21 = vpop.f32.mrf.mxu1  ;;  %v370_v28 = vmul.f32 %v695_v14, %v352_v18  ;;  %v372_v29 = vmul.f32 %v695_v14, %v357_v19 }
  0xd4   : > { %v367_v24 = vmul.f32 %v695_v14, %v344_v20  ;;  %v369_v25 = vmul.f32 %v695_v14, %v349_v21 }
  0xd5   : > { %v382_v38 = vadd.f32 %v696_v16, %v370_v28  ;;  %v384_v39 = vadd.f32 %v696_v16, %v372_v29 }
  0xd6   : > { %v379_v26 = vadd.f32 %v696_v16, %v367_v24  ;;  %v381_v27 = vadd.f32 %v696_v16, %v369_v25 }
  0xd7   : > { %v390_v44 = vmax.f32 %v382_v38, 0.0  ;;  %v392_v45 = vmax.f32 %v384_v39, 0.0 }
  0xd8   : > { %v387_v32 = vmax.f32 %v379_v26, 0.0  ;;  %v389_v33 = vmax.f32 %v381_v27, 0.0 }
  0xda   : > { %v590_v34 = vpack.c.bf16 %v387_v32, %v386_v30  ;;  %v595_v35 = vpack.c.bf16 %v389_v33, %v388_v31  ;;  %v354_v36 = vpop.f32.mrf.mxu2  ;;  %v359_v37 = vpop.f32.mrf.mxu3 }
  0xdb   : > { %v371_v40 = vmul.f32 %v695_v14, %v354_v36  ;;  %v373_v41 = vmul.f32 %v695_v14, %v359_v37 }
  0xdc   : > { %591 = vst [vmem:[%s234_s11] sm:$0xff] %v590_v34  }
  0xdd   : > { %607 = vst [vmem:[%s234_s11 + $0x8] sm:$0xff] %v595_v35   ;;  %v383_v42 = vadd.f32 %v696_v16, %v371_v40  ;;  %v385_v43 = vadd.f32 %v696_v16, %v373_v41 }
  0xdf   : > { %v391_v46 = vmax.f32 %v383_v42, 0.0  ;;  %v393_v47 = vmax.f32 %v385_v43, 0.0 }
  0xe1   : > { %v600_v48 = vpack.c.bf16 %v391_v46, %v390_v44  ;;  %v605_v49 = vpack.c.bf16 %v393_v47, %v392_v45 }
  0xe3   : > { %608 = vst [vmem:[%s234_s11 + $0x10] sm:$0xff] %v600_v48  }
  0xe4   : > { %609 = vst [vmem:[%s234_s11 + $0x18] sm:$0xff] %v605_v49  }
  0xe5   : > { %784 = shalt.err (!%p781_p10)
}
  0xe6   : > { %s832_s10 = smov 64   ;;  %s833_s30 = smov 4  }
  0xe7   : > { %640 = dma.vmem_to_hbm [thread:$0]  (%p928_p3), %s424_s13, 512, %s426_s19, %s411_s12, %s832_s10, %s832_s10, %s833_s30  }
  0xe8 PF: > { %s440_s5 = sand.u32 1, %s815_s15   ;;  %p1029_p12 = scmp.ge.s32.totalorder %s827_s18, 2 }
  0xe9   : > { %s441_s23 = scalar_lea.sflag [#allocation4], %s440_s5 }
  0xea   : > { %p651_p13 = pnand %p1029_p12, %p894_p6 }
  0xec   : > { %p652_p0 = pneg %p651_p13 }
  0xee   : > { %810 = dma.done.wait (%p652_p0), %s441_s23, 512  }
  0xef   : > { %812 = vsyncadd (%p652_p0), %s441_s23, 4294966784  ;;  %p18_p5 = scmp.ge.s32.totalorder %s912_s29, 4   ;;  %s1030_s15 = smov %s819_s16 }
  0xf0   : > { %s1031_s16 = smov %s823_s17  ;;  %s1032_s17 = smov %s924_s8 }
  0xf1   : > { %s1033_s18 = smov %s912_s29  ;;  %20 = sbr.rel (!%p18_p5) target bundleno = 6 (0x6), region = 85 }
  0xf6   :  { %447 = vsyncpa [#allocation3], 1 }
  0xf7   :  { %449 = vsyncpa [#allocation3 + $0x1], 1 }
  0xf8   :  { %450 = vsyncpa [#allocation6], 1 }
  0xf9   :  { %451 = vsyncpa [#allocation4], 1 }
  0xfa   :  { %453 = vsyncpa [#allocation4 + $0x1], 1 }

</bundles_post_ra>
